<compile_context>
chip_gen: v5e
topology: v5e:2x2
jax: 0.10.0
libtpu: 0.0.40
codegen_flags: <defaults>
</compile_context>

<pallas_src>
import functools

import jax
import jax.numpy as jnp
from jax.experimental import pallas as pl
from jax.experimental.pallas import tpu as pltpu

LANES = 128      # lane-dense fused output width (actor lanes | value lane | zero pad)
NEG_BIG = -1e30  # finite softmax mask sentinel (exp underflows to exactly 0)


def actor_critic_kernel(x_ref, w1_ref, b1_ref, w_head_ref, b_head_ref, out_ref,
                        *, num_actions, input_dim):
    x = x_ref[...]                                        # [TB, D_in]

    # ---- shared trunk: Linear(input_dim -> 64) + ReLU ----------------------
    if input_dim <= 8:
        # Tiny contraction dim: a few VPU broadcast FMAs beat an MXU push that
        # would use <1% of the systolic array and still pay full drain latency.
        w1 = w1_ref[...]                                  # [D_in, 64]
        h = x[:, 0:1] * w1[0:1, :]
        for k in range(1, input_dim):                     # static unroll
            h = h + x[:, k:k + 1] * w1[k:k + 1, :]
        h = h + b1_ref[...]
    else:
        h = jnp.dot(x, w1_ref[...], preferred_element_type=jnp.float32) + b1_ref[...]
    h = jnp.maximum(h, 0.0)                               # [TB, 64]

    # ---- fused actor + critic head: one [64, 128] matmul -------------------
    fused = jnp.dot(h, w_head_ref[...], preferred_element_type=jnp.float32)
    fused = fused + b_head_ref[...]                       # [TB, 128]

    lane = jax.lax.broadcasted_iota(jnp.int32, fused.shape, 1)
    actor_mask = lane < num_actions                       # lanes [0, A)
    value_mask = lane == num_actions                      # lane A

    # softmax over the actor lanes only (numerically stable, max-subtracted).
    # Masked lanes use a large finite negative value so exp() is exactly 0.
    logits = jnp.where(actor_mask, fused, jnp.float32(NEG_BIG))
    m = jnp.max(logits, axis=-1, keepdims=True)           # [TB, 1]
    e = jnp.exp(logits - m)                               # 0 on off-actor lanes
    denom = jnp.sum(e, axis=-1, keepdims=True)            # [TB, 1]
    inv = 1.0 / denom                                     # exact: TB divides only
    probs = e * inv                                       # rows sum to 1 exactly

    # single lane-dense store: [probs | value | zeros]
    out_ref[...] = jnp.where(actor_mask, probs,
                             jnp.where(value_mask, fused, 0.0))


def actor_critic_forward(x, fused_params, *, num_actions, tile_b=512):
    """x: [B, input_dim] f32. fused_params: output of fuse_head_params()."""
    B, D_in = x.shape
    H = fused_params["w_shared"].shape[1]

    # Batch tile: multiple of 8 sublanes, capped at tile_b; pad B if needed.
    TB = max(8, (min(tile_b, B) // 8) * 8)
    B_pad = pl.cdiv(B, TB) * TB
    if B_pad != B:
        x = jnp.pad(x, ((0, B_pad - B), (0, 0)))

    kernel = functools.partial(actor_critic_kernel,
                               num_actions=num_actions, input_dim=D_in)

    out = pl.pallas_call(
        kernel,
        out_shape=jax.ShapeDtypeStruct((B_pad, LANES), jnp.float32),
        grid=(B_pad // TB,),
        in_specs=[
            pl.BlockSpec((TB, D_in), lambda i: (i, 0)),    # x: tiled over batch
            pl.BlockSpec((D_in, H), lambda i: (0, 0)),     # weights stay resident
            pl.BlockSpec((1, H), lambda i: (0, 0)),
            pl.BlockSpec((H, LANES), lambda i: (0, 0)),
            pl.BlockSpec((1, LANES), lambda i: (0, 0)),
        ],
        out_specs=pl.BlockSpec((TB, LANES), lambda i: (i, 0)),
        compiler_params=pltpu.CompilerParams(
            dimension_semantics=("parallel",)),            # shard across TCs (v7x)
    )(x, fused_params["w_shared"], fused_params["b_shared"],
      fused_params["w_head"], fused_params["b_head"])

    probs = out[:B, :num_actions]
    value = out[:B, num_actions:num_actions + 1]
    return probs, value


def init_params(key, input_dim, output_dim, hidden=64):
    """PyTorch nn.Linear default init U(-1/sqrt(fan_in), 1/sqrt(fan_in));
    weights stored transposed as [in, out] so the kernel computes x @ W + b."""
    keys = jax.random.split(key, 6)

    def linear(kw, kb, fan_in, fan_out):
        bound = 1.0 / jnp.sqrt(fan_in)
        w = jax.random.uniform(kw, (fan_in, fan_out), jnp.float32, -bound, bound)
        b = jax.random.uniform(kb, (1, fan_out), jnp.float32, -bound, bound)
        return w, b

    w1, b1 = linear(keys[0], keys[1], input_dim, hidden)
    w2, b2 = linear(keys[2], keys[3], hidden, output_dim)
    w3, b3 = linear(keys[4], keys[5], hidden, 1)
    return {"w_shared": w1, "b_shared": b1,
            "w_actor": w2, "b_actor": b2,
            "w_critic": w3, "b_critic": b3}


def fuse_head_params(params):
    """One-time (init-time) fusion of actor + critic heads into a lane-dense
    [hidden, 128] weight / [1, 128] bias (actor in lanes [0:A], critic in lane A)."""
    H, A = params["w_actor"].shape
    assert A + 1 <= LANES, "fused head assumes output_dim + 1 <= 128"
    w_head = jnp.zeros((H, LANES), jnp.float32)
    w_head = w_head.at[:, :A].set(params["w_actor"])
    w_head = w_head.at[:, A:A + 1].set(params["w_critic"])
    b_head = jnp.zeros((1, LANES), jnp.float32)
    b_head = b_head.at[:, :A].set(params["b_actor"])
    b_head = b_head.at[:, A:A + 1].set(params["b_critic"])
    return {"w_shared": params["w_shared"], "b_shared": params["b_shared"],
            "w_head": w_head, "b_head": b_head}


if __name__ == "__main__":
    # CartPole-like dims: observation dim 4, action dim 2; small batch of 8.
    input_dim, output_dim, batch = 4, 2, 8

    key = jax.random.PRNGKey(0)
    key_x, key_p = jax.random.split(key)

    x = jax.random.normal(key_x, (batch, input_dim), dtype=jnp.float32)
    params = init_params(key_p, input_dim, output_dim)
    fused_params = fuse_head_params(params)        # done once, outside the step

    fwd = jax.jit(functools.partial(actor_critic_forward, num_actions=output_dim))
    probs, value = fwd(x, fused_params)
    jax.block_until_ready((probs, value))

    # Pure-JAX reference (unfused) for correctness.
    h_ref = jnp.maximum(x @ params["w_shared"] + params["b_shared"], 0.0)
    ref_probs = jax.nn.softmax(h_ref @ params["w_actor"] + params["b_actor"], axis=-1)
    ref_value = h_ref @ params["w_critic"] + params["b_critic"]

    assert probs.shape == (batch, output_dim)
    assert value.shape == (batch, 1)
    # Exact normalization -> rows sum to 1 up to f32 rounding.
    assert jnp.allclose(jnp.sum(probs, axis=-1), 1.0, atol=1e-4)
    assert jnp.allclose(probs, ref_probs, rtol=2e-2, atol=2e-2)
    assert jnp.allclose(value, ref_value, rtol=2e-2, atol=2e-2)

    print("KERNEL_OK")
</pallas_src>

<mosaic_0001>
module attributes {stable_mosaic.version = 11 : i64} {
  func.func @actor_critic_kernel(%arg0: i32, %arg1: memref<8x4xf32, #tpu.memory_space<vmem>>, %arg2: memref<4x64xf32, #tpu.memory_space<vmem>>, %arg3: memref<1x64xf32, #tpu.memory_space<vmem>>, %arg4: memref<64x128xf32, #tpu.memory_space<vmem>>, %arg5: memref<1x128xf32, #tpu.memory_space<vmem>>, %arg6: memref<8x128xf32, #tpu.memory_space<vmem>>) attributes {dimension_semantics = [#tpu.dimension_semantics<parallel>], iteration_bounds = array<i64: 1>, scalar_prefetch = 0 : i64, scratch_operands = 0 : i64, tpu.core_type = #tpu.core_type<tc>, window_params = [{transform_indices = @transform_0, window_bounds = array<i64: 8, 4>}, {pipeline_mode = #tpu.pipeline_mode<synchronous>, transform_indices = @transform_1, window_bounds = array<i64: 4, 64>}, {pipeline_mode = #tpu.pipeline_mode<synchronous>, transform_indices = @transform_2, window_bounds = array<i64: 1, 64>}, {pipeline_mode = #tpu.pipeline_mode<synchronous>, transform_indices = @transform_3, window_bounds = array<i64: 64, 128>}, {pipeline_mode = #tpu.pipeline_mode<synchronous>, transform_indices = @transform_4, window_bounds = array<i64: 1, 128>}, {transform_indices = @transform_5, window_bounds = array<i64: 8, 128>}]} {
    %c0 = arith.constant 0 : index
    %c0_0 = arith.constant 0 : index
    %0 = vector.load %arg1[%c0, %c0_0] : memref<8x4xf32, #tpu.memory_space<vmem>>, vector<8x4xf32>
    %c0_1 = arith.constant 0 : index
    %c0_2 = arith.constant 0 : index
    %1 = vector.load %arg2[%c0_1, %c0_2] : memref<4x64xf32, #tpu.memory_space<vmem>>, vector<4x64xf32>
    %2 = vector.extract_strided_slice %0 {offsets = [0, 0], sizes = [8, 1], strides = [1, 1]} : vector<8x4xf32> to vector<8x1xf32>
    %3 = vector.extract_strided_slice %1 {offsets = [0, 0], sizes = [1, 64], strides = [1, 1]} : vector<4x64xf32> to vector<1x64xf32>
    %4 = vector.broadcast %2 : vector<8x1xf32> to vector<8x64xf32>
    %5 = vector.broadcast %3 : vector<1x64xf32> to vector<8x64xf32>
    %6 = arith.mulf %4, %5 : vector<8x64xf32>
    %7 = vector.extract_strided_slice %0 {offsets = [0, 1], sizes = [8, 1], strides = [1, 1]} : vector<8x4xf32> to vector<8x1xf32>
    %8 = vector.extract_strided_slice %1 {offsets = [1, 0], sizes = [1, 64], strides = [1, 1]} : vector<4x64xf32> to vector<1x64xf32>
    %9 = vector.broadcast %7 : vector<8x1xf32> to vector<8x64xf32>
    %10 = vector.broadcast %8 : vector<1x64xf32> to vector<8x64xf32>
    %11 = arith.mulf %9, %10 : vector<8x64xf32>
    %12 = arith.addf %6, %11 : vector<8x64xf32>
    %13 = vector.extract_strided_slice %0 {offsets = [0, 2], sizes = [8, 1], strides = [1, 1]} : vector<8x4xf32> to vector<8x1xf32>
    %14 = vector.extract_strided_slice %1 {offsets = [2, 0], sizes = [1, 64], strides = [1, 1]} : vector<4x64xf32> to vector<1x64xf32>
    %15 = vector.broadcast %13 : vector<8x1xf32> to vector<8x64xf32>
    %16 = vector.broadcast %14 : vector<1x64xf32> to vector<8x64xf32>
    %17 = arith.mulf %15, %16 : vector<8x64xf32>
    %18 = arith.addf %12, %17 : vector<8x64xf32>
    %19 = vector.extract_strided_slice %0 {offsets = [0, 3], sizes = [8, 1], strides = [1, 1]} : vector<8x4xf32> to vector<8x1xf32>
    %20 = vector.extract_strided_slice %1 {offsets = [3, 0], sizes = [1, 64], strides = [1, 1]} : vector<4x64xf32> to vector<1x64xf32>
    %21 = vector.broadcast %19 : vector<8x1xf32> to vector<8x64xf32>
    %22 = vector.broadcast %20 : vector<1x64xf32> to vector<8x64xf32>
    %23 = arith.mulf %21, %22 : vector<8x64xf32>
    %24 = arith.addf %18, %23 : vector<8x64xf32>
    %c0_3 = arith.constant 0 : index
    %c0_4 = arith.constant 0 : index
    %25 = vector.load %arg3[%c0_3, %c0_4] : memref<1x64xf32, #tpu.memory_space<vmem>>, vector<1x64xf32>
    %26 = vector.broadcast %25 : vector<1x64xf32> to vector<8x64xf32>
    %27 = arith.addf %24, %26 : vector<8x64xf32>
    %cst = arith.constant 0.000000e+00 : f32
    %28 = vector.broadcast %cst : f32 to vector<8x64xf32>
    %29 = arith.maximumf %27, %28 : vector<8x64xf32>
    %c0_5 = arith.constant 0 : index
    %c0_6 = arith.constant 0 : index
    %30 = vector.load %arg4[%c0_5, %c0_6] : memref<64x128xf32, #tpu.memory_space<vmem>>, vector<64x128xf32>
    %cst_7 = arith.constant dense<0.000000e+00> : vector<8x128xf32>
    %31 = tpu.matmul %29, %30, %cst_7 {dimension_numbers = #tpu.dot_dimension_numbers<[1], [0], [0], [1], [0, 0, 1, 1], [], []>} : vector<8x64xf32>, vector<64x128xf32>, vector<8x128xf32> -> vector<8x128xf32>
    %c0_8 = arith.constant 0 : index
    %c0_9 = arith.constant 0 : index
    %32 = vector.load %arg5[%c0_8, %c0_9] : memref<1x128xf32, #tpu.memory_space<vmem>>, vector<1x128xf32>
    %33 = vector.broadcast %32 : vector<1x128xf32> to vector<8x128xf32>
    %34 = arith.addf %31, %33 : vector<8x128xf32>
    %35 = tpu.iota {dimensions = array<i32: 1>} : vector<8x128xi32>
    %c2_i32 = arith.constant 2 : i32
    %36 = vector.broadcast %c2_i32 : i32 to vector<8x128xi32>
    %37 = arith.cmpi slt, %35, %36 : vector<8x128xi32>
    %c2_i32_10 = arith.constant 2 : i32
    %38 = vector.broadcast %c2_i32_10 : i32 to vector<8x128xi32>
    %39 = arith.cmpi eq, %35, %38 : vector<8x128xi32>
    %cst_11 = arith.constant -1.000000e+30 : f32
    %40 = vector.broadcast %cst_11 : f32 to vector<8x128xf32>
    %41 = arith.select %37, %34, %40 : vector<8x128xi1>, vector<8x128xf32>
    %cst_12 = arith.constant dense<0xFF800000> : vector<8xf32>
    %42 = vector.multi_reduction <maximumf>, %41, %cst_12 [1] : vector<8x128xf32> to vector<8xf32>
    %43 = vector.shape_cast %42 : vector<8xf32> to vector<8x1xf32>
    %44 = vector.broadcast %43 : vector<8x1xf32> to vector<8x128xf32>
    %45 = arith.subf %41, %44 : vector<8x128xf32>
    %46 = math.exp %45 : vector<8x128xf32>
    %cst_13 = arith.constant dense<0.000000e+00> : vector<8xf32>
    %47 = vector.multi_reduction <add>, %46, %cst_13 [1] : vector<8x128xf32> to vector<8xf32>
    %48 = vector.shape_cast %47 : vector<8xf32> to vector<8x1xf32>
    %cst_14 = arith.constant 1.000000e+00 : f32
    %49 = vector.broadcast %cst_14 : f32 to vector<8x1xf32>
    %50 = arith.divf %49, %48 : vector<8x1xf32>
    %51 = vector.broadcast %50 : vector<8x1xf32> to vector<8x128xf32>
    %52 = arith.mulf %46, %51 : vector<8x128xf32>
    %cst_15 = arith.constant 0.000000e+00 : f32
    %53 = vector.broadcast %cst_15 : f32 to vector<8x128xf32>
    %54 = arith.select %39, %34, %53 : vector<8x128xi1>, vector<8x128xf32>
    %55 = arith.select %37, %52, %54 : vector<8x128xi1>, vector<8x128xf32>
    %c0_16 = arith.constant 0 : index
    %c0_17 = arith.constant 0 : index
    %56 = vector.load %arg6[%c0_16, %c0_17] : memref<8x128xf32, #tpu.memory_space<vmem>>, vector<8x128xf32>
    tpu.vector_store %arg6[%c0_16, %c0_17], %55 {strides = array<i32>} : memref<8x128xf32, #tpu.memory_space<vmem>>, vector<8x128xf32>,
    return
  }
  func.func @transform_0(%arg0: i32) -> (i32, i32) {
    %c0_i32 = arith.constant 0 : i32
    %c0_i32_0 = arith.constant 0 : i32
    return %arg0, %c0_i32 : i32, i32
  }
  func.func @transform_1(%arg0: i32) -> (i32, i32) {
    %c0_i32 = arith.constant 0 : i32
    %c0_i32_0 = arith.constant 0 : i32
    %c0_i32_1 = arith.constant 0 : i32
    return %c0_i32, %c0_i32_0 : i32, i32
  }
  func.func @transform_2(%arg0: i32) -> (i32, i32) {
    %c0_i32 = arith.constant 0 : i32
    %c0_i32_0 = arith.constant 0 : i32
    %c0_i32_1 = arith.constant 0 : i32
    return %c0_i32, %c0_i32_0 : i32, i32
  }
  func.func @transform_3(%arg0: i32) -> (i32, i32) {
    %c0_i32 = arith.constant 0 : i32
    %c0_i32_0 = arith.constant 0 : i32
    %c0_i32_1 = arith.constant 0 : i32
    return %c0_i32, %c0_i32_0 : i32, i32
  }
  func.func @transform_4(%arg0: i32) -> (i32, i32) {
    %c0_i32 = arith.constant 0 : i32
    %c0_i32_0 = arith.constant 0 : i32
    %c0_i32_1 = arith.constant 0 : i32
    return %c0_i32, %c0_i32_0 : i32, i32
  }
  func.func @transform_5(%arg0: i32) -> (i32, i32) {
    %c0_i32 = arith.constant 0 : i32
    %c0_i32_0 = arith.constant 0 : i32
    return %arg0, %c0_i32 : i32, i32
  }
}

</mosaic_0001>

<bundles_post_ra>
// kernel: actor_critic_forward.1
= control target key start
LH: loop header
LB: loop body
LE: loop exit
PB: predicated region body
PF: predicated region fallthrough
CT: control target
= control target key end

     0   :  { %10 = vsyncpa [#allocation3], 0  ;;  %s189_s21 = smov [#allocation2]   ;;  %s190_s23 = smov 128   ;;  %s246_s0 = inlined_call_operand.vmem [shape: f32[8,4], index: 0, kind: input, shape index: {}]   ;;  %s247_s1 = inlined_call_operand.vmem [shape: f32[4,64], index: 1, kind: input, shape index: {}]   ;;  %s248_s2 = inlined_call_operand.vmem [shape: f32[1,64], index: 2, kind: input, shape index: {}]   ;;  %s249_s3 = inlined_call_operand.hbm [shape: f32[64,128], index: 3, kind: input, shape index: {}]   ;;  %s250_s4 = inlined_call_operand.vmem [shape: f32[1,128], index: 4, kind: input, shape index: {}]   ;;  %s251_s5 = inlined_call_operand.vmem [shape: f32[8,128], index: 5, kind: output, shape index: {}]  }
   0x1   :  { %s21_s20 = sshll.u32 %s249_s3, 4  ;;  %s23_s22 = sshll.u32 %s189_s21, 4  ;;  %s22_s20 = int_to_ptr.hbm [resolvable:$true] %s21_s20  ;;  %s24_s22 = int_to_ptr.vmem [resolvable:$true] %s23_s22 }
   0x2   :  { %s191_s24 = smov 8  }
   0x3   :  { %29 = dma.hbm_to_vmem [thread:$0]  %s22_s20, 1024, %s24_s22, [#allocation3], %s190_s23, %s190_s23, %s191_s24  }
   0x4   :  { %187 = dma.done.wait [#allocation3], 1024  }
   0x5   :  { %188 = vsyncadd [#allocation3], 4294966272  ;;  %v192_v0 = vmov 0   ;;  %v193_v1 = vmov 2   ;;  %v36_v2 = vld [vmem:[%s246_s0] sm:$0xff]  ;;  %v194_v3 = vmov 1   ;;  %v108_v32 = vlaneseq }
   0x6   :  { %152 = vset.pattern.permute.xlu0 %v192_v0  ;;  %154 = vset.pattern.permute.xlu1 %v193_v1  ;;  %v195_v4 = vmov 3   ;;  %v79_v5 = vld [vmem:[#allocation2 + $0x38] sm:$0xff]  ;;  %v78_v6 = vld [vmem:[#allocation2 + $0x30] sm:$0xff]  ;;  %v77_v7 = vld [vmem:[#allocation2 + $0x28] sm:$0xff]  ;;  %vm84_vm0 = vcmask 523264  }
   0x7   :  { %40 = vperm.xlu0 %152, %v36_v2   ;;  %53 = vperm.xlu1 %154, %v36_v2   ;;  %v76_v8 = vld [vmem:[#allocation2 + $0x20] sm:$0xff]  ;;  %v75_v9 = vld [vmem:[#allocation2 + $0x18] sm:$0xff]  ;;  %v74_v10 = vld [vmem:[#allocation2 + $0x10] sm:$0xff]  ;;  %v109_v33 = vand.u32 127, %v108_v32 }
   0x8   :  { %96 = vmatpush.msra.mxu0 %v79_v5  ;;  %v73_v11 = vld [vmem:[#allocation2 + $0x8] sm:$0xff]  ;;  %v72_v12 = vld [vmem:[#allocation2] sm:$0xff] }
   0x9   :  { %v37_v15 = vld [vmem:[%s247_s1] sm:$0xf]  ;;  %vm111_vm1 = vcmp.eq.s32.totalorder %v109_v33, 2  ;;  %vm110_vm2 = vcmp.lt.s32.totalorder %v109_v33, 2 }
   0xa   :  { %97 = vmatpush.msra.mxu0 %v78_v6  ;;  %v43_v16 = vperm.slane %v37_v15, 0  ;;  %v49_v17 = vperm.slane %v37_v15, 1  ;;  %v56_v18 = vperm.slane %v37_v15, 2  ;;  %v63_v19 = vperm.slane %v37_v15, 3  ;;  %v157_v28 = vld [vmem:[%s248_s2] ss:$0 sm:$0xff] }
   0xb   :  { %v158_v34 = vld [vmem:[%s250_s4] ss:$0 sm:$0xff] }
   0xc   :  { %98 = vmatpush.msra.mxu0 %v77_v7 }
   0xe   :  { %99 = vmatpush.msra.mxu0 %v76_v8 }
   0xf   :  { %153 = vset.pattern.permute.xlu0 %v194_v3  ;;  %155 = vset.pattern.permute.xlu1 %v195_v4 }
  0x10   :  { %46 = vperm.xlu0 %153, %v36_v2   ;;  %60 = vperm.xlu1 %155, %v36_v2  }
  0x11   :  { %100 = vmatpush.msra.mxu0 %v75_v9 }
  0x13   :  { %101 = vmatpush.msra.mxu0 %v74_v10 }
  0x15   :  { %102 = vmatpush.msra.mxu0 %v73_v11 }
  0x17   :  { %103 = vmatpush.msra.mxu0 %v72_v12 }
  0x18   :  { %156 = vset.pattern.permute.xlu0 %v195_v4 }
  0x79   :  { %v41_v13 = vpop.permute.xlu0 %40  ;;  %v54_v14 = vpop.permute.xlu1 %53 }
  0x7a   :  { %v44_v22 = vmul.f32 %v43_v16, %v41_v13  ;;  %v57_v24 = vmul.f32 %v56_v18, %v54_v14 }
  0x82   :  { %v47_v20 = vpop.permute.xlu0 %46  ;;  %v61_v21 = vpop.permute.xlu1 %60 }
  0x83   :  { %v50_v23 = vmul.f32 %v49_v17, %v47_v20  ;;  %v64_v26 = vmul.f32 %v63_v19, %v61_v21 }
  0x85   :  { %v51_v25 = vadd.f32 %v50_v23, %v44_v22 }
  0x87   :  { %v58_v27 = vadd.f32 %v57_v24, %v51_v25 }
  0x89   :  { %v65_v29 = vadd.f32 %v64_v26, %v58_v27 }
  0x8b   :  { %v70_v30 = vadd.f32 %v157_v28, %v65_v29 }
  0x8d   :  { %v71_v31 = vmax.f32 %v70_v30, 0.0 }
  0x8f   :  { %144 = vmatmul.msk.f32.vlgmr.msra.gmra.mxu0 %vm84_vm0, %v71_v31 }
 0x10c   :  { %v105_v35 = vpop.f32.mrf.mxu0 }
 0x10d   :  { %v106_v36 = vadd.f32 %v158_v34, %v105_v35 }
 0x10f   :  { %v136_v37 = vsel %vm111_vm1, %v106_v36, 0.0  ;;  %v112_v38 = vsel %vm110_vm2, %v106_v36, -1e+30 }
 0x110   :  { %113 = vmax.xlane.f32.xlu2 %v112_v38 }
 0x183   :  { %v114_v39 = vpop.xlane.xlu2 %113 }
 0x184   :  { %v115_v40 = vsub.f32 %v112_v38, %v114_v39 }
 0x186   :  { %v116_v41 = vmul.f32 1.442695, %v115_v40 }
 0x188   :  { %159 = vpow2.f32 %v116_v41 }
 0x18e   :  { %v160_v42 = vpop.eup %159 }
 0x18f   :  { %118 = vadd.xlane.f32.xlu2 %v160_v42 }
 0x202   :  { %v119_v43 = vpop.xlane.xlu2 %118 }
 0x203   :  { %161 = vrcp.f32 %v119_v43  ;;  %v131_v47 = vand.u32 2147483648, %v119_v43  ;;  %v129_v49 = vand.u32 2147483647, %v119_v43  ;;  %vm125_vm4 = vweird.f32 %v119_v43 }
 0x205   :  { %v132_v51 = vor.u32 1.1754944e-38, %v131_v47  ;;  %vm130_vm6 = vcmp.eq.f32.partialorder %v129_v49, 8.507059e+37 }
 0x209   :  { %v162_v44 = vpop.eup %161 }
 0x20a   :  { %v121_v45 = vmul.f32 %v162_v44, %v119_v43  ;;  %vm126_vm3 = vweird.f32 %v162_v44 }
 0x20b   :  { %vm127_vm5 = vmor %vm125_vm4, %vm126_vm3 }
 0x20c   :  { %v122_v46 = vsub.f32 1.0, %v121_v45 }
 0x20e   :  { %v123_v48 = vmul.f32 %v162_v44, %v122_v46 }
 0x210   :  { %v124_v50 = vadd.f32 %v162_v44, %v123_v48 }
 0x212   :  { %v128_v52 = vsel %vm127_vm5, %v162_v44, %v124_v50 }
 0x213   :  { %v133_v53 = vsel %vm130_vm6, %v132_v51, %v128_v52 }
 0x214   :  { %v135_v54 = vmul.f32 %v160_v42, %v133_v53 }
 0x216   :  { %v137_v55 = vsel %vm110_vm2, %v135_v54, %v136_v37 }
 0x217   :  { %138 = vst [vmem:[%s251_s5] sm:$0xff] %v137_v55 }
 0x218   :  { %143 = vsyncpa [#allocation3], 1 }

</bundles_post_ra>
